<compile_context>
chip_gen: v5e
topology: v5e:2x2
jax: 0.10.0
libtpu: 0.0.40
codegen_flags: <defaults>
</compile_context>

<pallas_src>
import functools

import jax
import jax.numpy as jnp
from jax.experimental import pallas as pl
from jax.experimental.pallas import tpu as pltpu


def _round_up(x, m):
    return ((x + m - 1) // m) * m


# Gate order matches the PyTorch forward: i, f_s, f_t, o, c.
_GATE_NAMES = (("Ui", "Wti", "Wsi", "bi"),   # input gate
               ("Us", "Wts", "Wss", "bs"),   # spatial forget gate
               ("Ut", "Wtt", "Wst", "bt"),   # temporal forget gate
               ("Uo", "Wto", "Wso", "bo"),   # output gate
               ("Uc", "Wtc", "Wsc", "bc"))   # candidate cell


def _pick_tile(h_pad, k_pad, w_itemsize, vmem_budget_bytes=24 * 2**20):
    """Largest 128-multiple tile that divides h_pad and whose double-buffered
    weight stripe fits a v7x-safe VMEM budget (64 MiB physical, 32 MiB scoped)."""
    best = 128
    tn = 128
    while tn <= min(h_pad, 512):
        if h_pad % tn == 0 and 2 * k_pad * 5 * tn * w_itemsize <= vmem_budget_bytes:
            best = tn
        tn += 128
    return best


def st_lstm_kernel(z_ref, w_ref, ct_ref, cs_ref, h_out_ref, c_out_ref, *, tn):
    # One MXU pass per hidden tile: [B, k_pad] @ [k_pad, 5*tn], bias folded in
    # via the ones column of Z / bias row of W.  f32 accumulation.
    gates = jnp.dot(z_ref[...], w_ref[...],
                    preferred_element_type=jnp.float32)         # [B, 5*tn] f32

    # Two whole-stripe EUP passes; every slice starts/ends on a 128-lane
    # boundary (tn % 128 == 0), so no cross-lane relayout.
    sig = jax.nn.sigmoid(gates[:, : 4 * tn])                     # i, f_s, f_t, o
    c_n = jnp.tanh(gates[:, 4 * tn: 5 * tn])                     # candidate cell

    i_n   = sig[:, 0 * tn: 1 * tn]
    f_s_n = sig[:, 1 * tn: 2 * tn]
    f_t_n = sig[:, 2 * tn: 3 * tn]
    o_n   = sig[:, 3 * tn: 4 * tn]

    # Pure-VPU combine on full [B, tn] tiles (c_t / c_s arrive zero-padded).
    c_h = i_n * c_n + f_t_n * ct_ref[...] + f_s_n * cs_ref[...]
    h = o_n * jnp.tanh(c_h)

    # Lane-dense, unmasked stores of the full padded tile.
    h_out_ref[...] = h.astype(h_out_ref.dtype)
    c_out_ref[...] = c_h.astype(c_out_ref.dtype)


def st_lstm_cell(x, h_t, h_s, c_t, c_s, w_packed, *, tn):
    """One ST-LSTM cell step with pre-packed weights (see pack_params)."""
    B, input_size = x.shape
    hidden = h_t.shape[-1]
    k_pad, n_total = w_packed.shape
    h_pad = n_total // 5
    n_tiles = h_pad // tn
    k = input_size + 2 * hidden + 1
    assert k_pad == _round_up(k, 8) and h_pad % tn == 0

    wdt = w_packed.dtype
    w_itemsize = jnp.dtype(wdt).itemsize

    # Fused LHS [x | h_t | h_s | 1 | 0-pad]: one operand covers all three
    # products and the bias add, K padded to a multiple of 8.
    z = jnp.concatenate(
        [x.astype(wdt), h_t.astype(wdt), h_s.astype(wdt),
         jnp.ones((B, 1), dtype=wdt),
         jnp.zeros((B, k_pad - k), dtype=wdt)], axis=-1)          # [B, k_pad]

    # Cell state stays f32 (gate math is f32), zero-padded to h_pad lanes.
    pad = h_pad - hidden
    ct_p = jnp.pad(c_t.astype(jnp.float32), ((0, 0), (0, pad)))
    cs_p = jnp.pad(c_s.astype(jnp.float32), ((0, 0), (0, pad)))

    kernel = functools.partial(st_lstm_kernel, tn=tn)

    # Explicit scoped-VMEM budget: double-buffered W stripe + Z + state/out tiles.
    tile_bytes = (2 * k_pad * 5 * tn * w_itemsize
                  + 2 * B * k_pad * w_itemsize
                  + 2 * 2 * B * tn * 4          # c_t / c_s tiles
                  + 2 * 2 * B * tn * 4)         # h / c output tiles
    vmem_limit = int(min(100 * 2**20, max(32 * 2**20, 2 * tile_bytes)))

    cost = pl.CostEstimate(
        flops=2 * B * k_pad * 5 * h_pad,
        transcendentals=6 * B * h_pad,
        bytes_accessed=(w_packed.size * w_itemsize + z.size * w_itemsize
                        + ct_p.size * 4 + cs_p.size * 4 + 2 * B * h_pad * 4),
    )

    h_full, c_full = pl.pallas_call(
        kernel,
        out_shape=(
            jax.ShapeDtypeStruct((B, h_pad), jnp.float32),
            jax.ShapeDtypeStruct((B, h_pad), jnp.float32),
        ),
        grid=(n_tiles,),
        in_specs=[
            pl.BlockSpec((B, k_pad), lambda t: (0, 0)),        # Z: constant block
            pl.BlockSpec((k_pad, 5 * tn), lambda t: (0, t)),   # W stripe advances
            pl.BlockSpec((B, tn), lambda t: (0, t)),           # c_t tile
            pl.BlockSpec((B, tn), lambda t: (0, t)),           # c_s tile
        ],
        out_specs=(
            pl.BlockSpec((B, tn), lambda t: (0, t)),           # h tile (lane-dense)
            pl.BlockSpec((B, tn), lambda t: (0, t)),           # c tile (lane-dense)
        ),
        compiler_params=pltpu.CompilerParams(
            dimension_semantics=("parallel",),
            vmem_limit_bytes=vmem_limit,
        ),
        cost_estimate=cost,
    )(z, w_packed, ct_p, cs_p)

    # Padding lanes dropped OUTSIDE the kernel, keeping the pallas stores dense.
    return h_full[:, :hidden], c_full[:, :hidden]


def make_raw_params(key, input_size, hidden_size):
    """20 standard-normal tensors mirroring torch.randn in ST_LSTMCell.__init__."""
    names_shapes = []
    for (u, wt, ws, b) in _GATE_NAMES:
        names_shapes += [(u, (input_size, hidden_size)),
                         (wt, (hidden_size, hidden_size)),
                         (ws, (hidden_size, hidden_size)),
                         (b, (hidden_size,))]
    keys = jax.random.split(key, len(names_shapes))
    return {name: jax.random.normal(k, shape, dtype=jnp.float32)
            for (name, shape), k in zip(names_shapes, keys)}


def pack_params(raw, input_size, hidden_size, *, tn=None, dtype=jnp.bfloat16):
    """Pack the 20 parameters into one gate-interleaved matmul operand.

    Rows (K axis) per gate block: [U_g (I rows); Wt_g (H); Ws_g (H); b_g (1)],
    zero-padded to k_pad = round_up(K, 8).
    Columns (N axis): [hidden_tile][gate][lane] — hidden tile t, gate g occupies
    lanes [t*5*tn + g*tn, t*5*tn + (g+1)*tn), so each grid step sees a
    contiguous [k_pad, 5*tn] stripe with 128-aligned per-gate sub-stripes.
    Default bf16 halves weight DMA; accumulation in the kernel stays f32.
    Returns (w_packed, tn)."""
    h_pad = _round_up(hidden_size, 128)
    k = input_size + 2 * hidden_size + 1
    k_pad = _round_up(k, 8)
    if tn is None:
        tn = _pick_tile(h_pad, k_pad, jnp.dtype(dtype).itemsize)
    assert h_pad % tn == 0 and tn % 128 == 0

    blocks = []
    for (u, wt, ws, b) in _GATE_NAMES:
        blk = jnp.concatenate(
            [raw[u], raw[wt], raw[ws], raw[b][None, :]], axis=0)   # [K, H]
        blk = jnp.pad(blk, ((0, k_pad - k), (0, h_pad - hidden_size)))
        blocks.append(blk)
    w = jnp.stack(blocks, axis=0)                                  # [5, k_pad, h_pad]
    n_tiles = h_pad // tn
    w = w.reshape(5, k_pad, n_tiles, tn)
    w = jnp.transpose(w, (1, 2, 0, 3))                             # [k_pad, n_tiles, 5, tn]
    w = w.reshape(k_pad, n_tiles * 5 * tn)
    return w.astype(dtype), tn


def st_lstm_ref(x, h_t, h_s, c_t, c_s, p):
    """Pure-JAX reference that mirrors the PyTorch forward literally."""
    i_n   = jax.nn.sigmoid(x @ p["Ui"] + h_t @ p["Wti"] + h_s @ p["Wsi"] + p["bi"])
    f_s_n = jax.nn.sigmoid(x @ p["Us"] + h_t @ p["Wts"] + h_s @ p["Wss"] + p["bs"])
    f_t_n = jax.nn.sigmoid(x @ p["Ut"] + h_t @ p["Wtt"] + h_s @ p["Wst"] + p["bt"])
    o_n   = jax.nn.sigmoid(x @ p["Uo"] + h_t @ p["Wto"] + h_s @ p["Wso"] + p["bo"])
    c_n   = jnp.tanh(x @ p["Uc"] + h_t @ p["Wtc"] + h_s @ p["Wsc"] + p["bc"])
    c_h = i_n * c_n + f_t_n * c_t + f_s_n * c_s
    return o_n * jnp.tanh(c_h), c_h


if __name__ == "__main__":
    B, INPUT_SIZE, HIDDEN_SIZE = 8, 16, 32

    key = jax.random.PRNGKey(0)
    k_params, k_x, k_ht, k_hs, k_ct, k_cs = jax.random.split(key, 6)

    raw = make_raw_params(k_params, INPUT_SIZE, HIDDEN_SIZE)

    x   = jax.random.normal(k_x,  (B, INPUT_SIZE),  dtype=jnp.float32)
    h_t = jax.random.normal(k_ht, (B, HIDDEN_SIZE), dtype=jnp.float32)
    h_s = jax.random.normal(k_hs, (B, HIDDEN_SIZE), dtype=jnp.float32)
    c_t = jax.random.normal(k_ct, (B, HIDDEN_SIZE), dtype=jnp.float32)
    c_s = jax.random.normal(k_cs, (B, HIDDEN_SIZE), dtype=jnp.float32)

    h_ref, c_ref = st_lstm_ref(x, h_t, h_s, c_t, c_s, raw)

    step = jax.jit(st_lstm_cell, static_argnames=("tn",))

    # Full-precision weights: tight correctness check against the reference.
    w_f32, tn_f32 = pack_params(raw, INPUT_SIZE, HIDDEN_SIZE, dtype=jnp.float32)
    h_out, c_out = step(x, h_t, h_s, c_t, c_s, w_f32, tn=tn_f32)
    jax.block_until_ready((h_out, c_out))
    assert h_out.shape == (B, HIDDEN_SIZE) and c_out.shape == (B, HIDDEN_SIZE)
    assert jnp.allclose(h_out, h_ref, atol=2e-4, rtol=2e-4)
    assert jnp.allclose(c_out, c_ref, atol=2e-4, rtol=2e-4)

    # Default bf16 weights (weight-DMA-bound path): looser tolerance, f32 accum.
    w_bf16, tn_bf16 = pack_params(raw, INPUT_SIZE, HIDDEN_SIZE)
    h_bf, c_bf = step(x, h_t, h_s, c_t, c_s, w_bf16, tn=tn_bf16)
    jax.block_until_ready((h_bf, c_bf))
    assert float(jnp.max(jnp.abs(h_bf - h_ref))) < 0.3
    assert float(jnp.max(jnp.abs(c_bf - c_ref))) < 0.3

    print("KERNEL_OK")
</pallas_src>

<mosaic_0001>
module attributes {stable_mosaic.version = 11 : i64} {
  func.func @st_lstm_kernel(%arg0: i32, %arg1: memref<8x88xf32, #tpu.memory_space<vmem>>, %arg2: memref<88x640xf32, #tpu.memory_space<vmem>>, %arg3: memref<8x128xf32, #tpu.memory_space<vmem>>, %arg4: memref<8x128xf32, #tpu.memory_space<vmem>>, %arg5: memref<8x128xf32, #tpu.memory_space<vmem>>, %arg6: memref<8x128xf32, #tpu.memory_space<vmem>>) attributes {dimension_semantics = [#tpu.dimension_semantics<parallel>], iteration_bounds = array<i64: 1>, scalar_prefetch = 0 : i64, scratch_operands = 0 : i64, tpu.core_type = #tpu.core_type<tc>, window_params = [{pipeline_mode = #tpu.pipeline_mode<synchronous>, transform_indices = @transform_0, window_bounds = array<i64: 8, 88>}, {transform_indices = @transform_1, window_bounds = array<i64: 88, 640>}, {transform_indices = @transform_2, window_bounds = array<i64: 8, 128>}, {transform_indices = @transform_3, window_bounds = array<i64: 8, 128>}, {transform_indices = @transform_4, window_bounds = array<i64: 8, 128>}, {transform_indices = @transform_5, window_bounds = array<i64: 8, 128>}]} {
    %c0 = arith.constant 0 : index
    %c0_0 = arith.constant 0 : index
    %0 = vector.load %arg1[%c0, %c0_0] : memref<8x88xf32, #tpu.memory_space<vmem>>, vector<8x88xf32>
    %c0_1 = arith.constant 0 : index
    %c0_2 = arith.constant 0 : index
    %1 = vector.load %arg2[%c0_1, %c0_2] : memref<88x640xf32, #tpu.memory_space<vmem>>, vector<88x640xf32>
    %cst = arith.constant dense<0.000000e+00> : vector<8x640xf32>
    %2 = tpu.matmul %0, %1, %cst {dimension_numbers = #tpu.dot_dimension_numbers<[1], [0], [0], [1], [0, 0, 1, 1], [], []>} : vector<8x88xf32>, vector<88x640xf32>, vector<8x640xf32> -> vector<8x640xf32>
    %3 = vector.extract_strided_slice %2 {offsets = [0, 0], sizes = [8, 512], strides = [1, 1]} : vector<8x640xf32> to vector<8x512xf32>
    %4 = arith.negf %3 : vector<8x512xf32>
    %5 = math.exp %4 : vector<8x512xf32>
    %cst_3 = arith.constant 1.000000e+00 : f32
    %6 = vector.broadcast %cst_3 : f32 to vector<8x512xf32>
    %7 = arith.addf %6, %5 : vector<8x512xf32>
    %8 = arith.divf %6, %7 : vector<8x512xf32>
    %9 = vector.extract_strided_slice %2 {offsets = [0, 512], sizes = [8, 128], strides = [1, 1]} : vector<8x640xf32> to vector<8x128xf32>
    %10 = math.tanh %9 : vector<8x128xf32>
    %11 = vector.extract_strided_slice %8 {offsets = [0, 0], sizes = [8, 128], strides = [1, 1]} : vector<8x512xf32> to vector<8x128xf32>
    %12 = vector.extract_strided_slice %8 {offsets = [0, 128], sizes = [8, 128], strides = [1, 1]} : vector<8x512xf32> to vector<8x128xf32>
    %13 = vector.extract_strided_slice %8 {offsets = [0, 256], sizes = [8, 128], strides = [1, 1]} : vector<8x512xf32> to vector<8x128xf32>
    %14 = vector.extract_strided_slice %8 {offsets = [0, 384], sizes = [8, 128], strides = [1, 1]} : vector<8x512xf32> to vector<8x128xf32>
    %15 = arith.mulf %11, %10 : vector<8x128xf32>
    %c0_4 = arith.constant 0 : index
    %c0_5 = arith.constant 0 : index
    %16 = vector.load %arg3[%c0_4, %c0_5] : memref<8x128xf32, #tpu.memory_space<vmem>>, vector<8x128xf32>
    %17 = arith.mulf %13, %16 : vector<8x128xf32>
    %18 = arith.addf %15, %17 : vector<8x128xf32>
    %c0_6 = arith.constant 0 : index
    %c0_7 = arith.constant 0 : index
    %19 = vector.load %arg4[%c0_6, %c0_7] : memref<8x128xf32, #tpu.memory_space<vmem>>, vector<8x128xf32>
    %20 = arith.mulf %12, %19 : vector<8x128xf32>
    %21 = arith.addf %18, %20 : vector<8x128xf32>
    %22 = math.tanh %21 : vector<8x128xf32>
    %23 = arith.mulf %14, %22 : vector<8x128xf32>
    %c0_8 = arith.constant 0 : index
    %c0_9 = arith.constant 0 : index
    %24 = vector.load %arg5[%c0_8, %c0_9] : memref<8x128xf32, #tpu.memory_space<vmem>>, vector<8x128xf32>
    tpu.vector_store %arg5[%c0_8, %c0_9], %23 {strides = array<i32>} : memref<8x128xf32, #tpu.memory_space<vmem>>, vector<8x128xf32>,
    %c0_10 = arith.constant 0 : index
    %c0_11 = arith.constant 0 : index
    %25 = vector.load %arg6[%c0_10, %c0_11] : memref<8x128xf32, #tpu.memory_space<vmem>>, vector<8x128xf32>
    tpu.vector_store %arg6[%c0_10, %c0_11], %21 {strides = array<i32>} : memref<8x128xf32, #tpu.memory_space<vmem>>, vector<8x128xf32>,
    return
  }
  func.func @transform_0(%arg0: i32) -> (i32, i32) {
    %c0_i32 = arith.constant 0 : i32
    %c0_i32_0 = arith.constant 0 : i32
    %c0_i32_1 = arith.constant 0 : i32
    return %c0_i32, %c0_i32_0 : i32, i32
  }
  func.func @transform_1(%arg0: i32) -> (i32, i32) {
    %c0_i32 = arith.constant 0 : i32
    %c0_i32_0 = arith.constant 0 : i32
    return %c0_i32, %arg0 : i32, i32
  }
  func.func @transform_2(%arg0: i32) -> (i32, i32) {
    %c0_i32 = arith.constant 0 : i32
    %c0_i32_0 = arith.constant 0 : i32
    return %c0_i32, %arg0 : i32, i32
  }
  func.func @transform_3(%arg0: i32) -> (i32, i32) {
    %c0_i32 = arith.constant 0 : i32
    %c0_i32_0 = arith.constant 0 : i32
    return %c0_i32, %arg0 : i32, i32
  }
  func.func @transform_4(%arg0: i32) -> (i32, i32) {
    %c0_i32 = arith.constant 0 : i32
    %c0_i32_0 = arith.constant 0 : i32
    return %c0_i32, %arg0 : i32, i32
  }
  func.func @transform_5(%arg0: i32) -> (i32, i32) {
    %c0_i32 = arith.constant 0 : i32
    %c0_i32_0 = arith.constant 0 : i32
    return %c0_i32, %arg0 : i32, i32
  }
}

</mosaic_0001>

<bundles_post_ra>
// kernel: st_lstm_cell.1
= control target key start
LH: loop header
LB: loop body
LE: loop exit
PB: predicated region body
PF: predicated region fallthrough
CT: control target
= control target key end

     0   :  { %11 = vsyncpa [#allocation3], 0  ;;  %s514_s0 = inlined_call_operand.vmem [shape: f32[8,88], index: 0, kind: input, shape index: {}]   ;;  %s515_s1 = inlined_call_operand.hbm [shape: f32[88,640], index: 1, kind: input, shape index: {}]   ;;  %s516_s2 = inlined_call_operand.vmem [shape: f32[8,128], index: 2, kind: input, shape index: {}]   ;;  %s517_s3 = inlined_call_operand.vmem [shape: f32[8,128], index: 3, kind: input, shape index: {}]   ;;  %s518_s4 = inlined_call_operand.hbm [shape: f32[8,128], index: 4, kind: output, shape index: {0}]   ;;  %s519_s5 = inlined_call_operand.hbm [shape: f32[8,128], index: 5, kind: output, shape index: {1}]  }
   0x1   :  { %12 = vsyncpa [#allocation4], 0 }
   0x2   :  { %13 = vsyncpa [#allocation7], 0  ;;  %s20_s20 = sshll.u32 %s515_s1, 4  ;;  %s430_s21 = smov [#allocation2]   ;;  %s21_s20 = int_to_ptr.hbm [resolvable:$true] %s20_s20 }
   0x3   :  { %s22_s22 = sshll.u32 %s430_s21, 4  ;;  %s431_s23 = smov 640   ;;  %s23_s22 = int_to_ptr.vmem [resolvable:$true] %s22_s22 }
   0x4   :  { %s432_s24 = smov 40  }
   0x5   :  { %28 = dma.hbm_to_vmem [thread:$0]  %s21_s20, 7040, %s23_s22, [#allocation3], %s431_s23, %s431_s23, %s432_s24  }
   0x6   :  { %424 = dma.done.wait [#allocation3], 7040  }
   0x7   :  { %425 = vsyncadd [#allocation3], 4294960256  ;;  %v88_v0 = vld [vmem:[#allocation2 + $0x190] sm:$0xff]  ;;  %v89_v1 = vld [vmem:[#allocation2 + $0x198] sm:$0xff]  ;;  %vm93_vm0 = vcmask 719872   ;;  %s433_s29 = smov [#allocation6]  }
   0x8   :  { %v90_v2 = vld [vmem:[#allocation2 + $0x1a0] sm:$0xff]  ;;  %102 = vmatpush.msra.mxu0 %v88_v0  ;;  %122 = vmatpush.msra.mxu1 %v89_v1  ;;  %v91_v3 = vld [vmem:[#allocation2 + $0x1a8] sm:$0xff]  ;;  %v84_v5 = vld [vmem:[#allocation2 + $0x170] sm:$0xff]  ;;  %s301_s30 = sshll.u32 %s433_s29, 4  ;;  %s303_s8 = sshll.u32 %s519_s5, 4  ;;  %s302_s30 = int_to_ptr.vmem [resolvable:$true] %s301_s30  ;;  %s304_s8 = int_to_ptr.hbm [resolvable:$true] %s303_s8 }
   0x9   :  { %v83_v4 = vld [vmem:[#allocation2 + $0x168] sm:$0xff]  ;;  %142 = vmatpush.msra.mxu2 %v90_v2  ;;  %162 = vmatpush.msra.mxu3 %v91_v3  ;;  %v85_v6 = vld [vmem:[#allocation2 + $0x178] sm:$0xff]  ;;  %v86_v7 = vld [vmem:[#allocation2 + $0x180] sm:$0xff]  ;;  %s292_s10 = sshll.u32 %s518_s4, 4  ;;  %s293_s10 = int_to_ptr.hbm [resolvable:$true] %s292_s10 }
   0xa   :  { %v78_v8 = vld [vmem:[#allocation2 + $0x140] sm:$0xff]  ;;  %103 = vmatpush.msra.mxu0 %v83_v4  ;;  %123 = vmatpush.msra.mxu1 %v84_v5  ;;  %v79_v9 = vld [vmem:[#allocation2 + $0x148] sm:$0xff]  ;;  %v80_v10 = vld [vmem:[#allocation2 + $0x150] sm:$0xff] }
   0xb   :  { %v81_v11 = vld [vmem:[#allocation2 + $0x158] sm:$0xff]  ;;  %143 = vmatpush.msra.mxu2 %v85_v6  ;;  %163 = vmatpush.msra.mxu3 %v86_v7  ;;  %v74_v13 = vld [vmem:[#allocation2 + $0x120] sm:$0xff]  ;;  %v75_v14 = vld [vmem:[#allocation2 + $0x128] sm:$0xff] }
   0xc   :  { %v73_v12 = vld [vmem:[#allocation2 + $0x118] sm:$0xff]  ;;  %104 = vmatpush.msra.mxu0 %v78_v8  ;;  %124 = vmatpush.msra.mxu1 %v79_v9  ;;  %v76_v15 = vld [vmem:[#allocation2 + $0x130] sm:$0xff]  ;;  %v70_v18 = vld [vmem:[#allocation2 + $0x100] sm:$0xff] }
   0xd   :  { %144 = vmatpush.msra.mxu2 %v80_v10  ;;  %164 = vmatpush.msra.mxu3 %v81_v11  ;;  %v68_v16 = vld [vmem:[#allocation2 + $0xf0] sm:$0xff]  ;;  %v69_v17 = vld [vmem:[#allocation2 + $0xf8] sm:$0xff]  ;;  %v71_v19 = vld [vmem:[#allocation2 + $0x108] sm:$0xff] }
   0xe   :  { %105 = vmatpush.msra.mxu0 %v73_v12  ;;  %125 = vmatpush.msra.mxu1 %v74_v13  ;;  %v63_v20 = vld [vmem:[#allocation2 + $0xc8] sm:$0xff]  ;;  %v64_v21 = vld [vmem:[#allocation2 + $0xd0] sm:$0xff]  ;;  %v65_v22 = vld [vmem:[#allocation2 + $0xd8] sm:$0xff] }
   0xf   :  { %145 = vmatpush.msra.mxu2 %v75_v14  ;;  %165 = vmatpush.msra.mxu3 %v76_v15  ;;  %v66_v23 = vld [vmem:[#allocation2 + $0xe0] sm:$0xff]  ;;  %v59_v25 = vld [vmem:[#allocation2 + $0xa8] sm:$0xff]  ;;  %v60_v26 = vld [vmem:[#allocation2 + $0xb0] sm:$0xff] }
  0x10   :  { %106 = vmatpush.msra.mxu0 %v68_v16  ;;  %126 = vmatpush.msra.mxu1 %v69_v17  ;;  %v58_v24 = vld [vmem:[#allocation2 + $0xa0] sm:$0xff]  ;;  %v61_v27 = vld [vmem:[#allocation2 + $0xb8] sm:$0xff]  ;;  %v55_v30 = vld [vmem:[#allocation2 + $0x88] sm:$0xff] }
  0x11   :  { %146 = vmatpush.msra.mxu2 %v70_v18  ;;  %166 = vmatpush.msra.mxu3 %v71_v19  ;;  %v53_v28 = vld [vmem:[#allocation2 + $0x78] sm:$0xff]  ;;  %v54_v29 = vld [vmem:[#allocation2 + $0x80] sm:$0xff]  ;;  %v56_v31 = vld [vmem:[#allocation2 + $0x90] sm:$0xff] }
  0x12   :  { %107 = vmatpush.msra.mxu0 %v63_v20  ;;  %127 = vmatpush.msra.mxu1 %v64_v21  ;;  %v48_v32 = vld [vmem:[#allocation2 + $0x50] sm:$0xff]  ;;  %v49_v33 = vld [vmem:[#allocation2 + $0x58] sm:$0xff]  ;;  %v50_v34 = vld [vmem:[#allocation2 + $0x60] sm:$0xff] }
  0x13   :  { %147 = vmatpush.msra.mxu2 %v65_v22  ;;  %167 = vmatpush.msra.mxu3 %v66_v23  ;;  %v51_v35 = vld [vmem:[#allocation2 + $0x68] sm:$0xff]  ;;  %v44_v37 = vld [vmem:[#allocation2 + $0x30] sm:$0xff]  ;;  %v45_v38 = vld [vmem:[#allocation2 + $0x38] sm:$0xff] }
  0x14   :  { %108 = vmatpush.msra.mxu0 %v58_v24  ;;  %128 = vmatpush.msra.mxu1 %v59_v25  ;;  %v43_v36 = vld [vmem:[#allocation2 + $0x28] sm:$0xff]  ;;  %v46_v39 = vld [vmem:[#allocation2 + $0x40] sm:$0xff]  ;;  %v40_v42 = vld [vmem:[#allocation2 + $0x10] sm:$0xff] }
  0x15   :  { %148 = vmatpush.msra.mxu2 %v60_v26  ;;  %168 = vmatpush.msra.mxu3 %v61_v27  ;;  %v38_v40 = vld [vmem:[#allocation2] sm:$0xff]  ;;  %v39_v41 = vld [vmem:[#allocation2 + $0x8] sm:$0xff]  ;;  %v41_v43 = vld [vmem:[#allocation2 + $0x18] sm:$0xff] }
  0x16   :  { %109 = vmatpush.msra.mxu0 %v53_v28  ;;  %129 = vmatpush.msra.mxu1 %v54_v29  ;;  %v37_v44 = vld [vmem:[%s514_s0] sm:$0xff]  ;;  %v92_v45 = vld [vmem:[#allocation2 + $0x1b0] sm:$0xff]  ;;  %v87_v46 = vld [vmem:[#allocation2 + $0x188] sm:$0xff] }
  0x17   :  { %149 = vmatpush.msra.mxu2 %v55_v30  ;;  %169 = vmatpush.msra.mxu3 %v56_v31  ;;  %v82_v47 = vld [vmem:[#allocation2 + $0x160] sm:$0xff]  ;;  %v77_v48 = vld [vmem:[#allocation2 + $0x138] sm:$0xff]  ;;  %v72_v49 = vld [vmem:[#allocation2 + $0x110] sm:$0xff] }
  0x18   :  { %110 = vmatpush.msra.mxu0 %v48_v32  ;;  %130 = vmatpush.msra.mxu1 %v49_v33  ;;  %v67_v50 = vld [vmem:[#allocation2 + $0xe8] sm:$0xff]  ;;  %v62_v51 = vld [vmem:[#allocation2 + $0xc0] sm:$0xff]  ;;  %v57_v52 = vld [vmem:[#allocation2 + $0x98] sm:$0xff] }
  0x19   :  { %150 = vmatpush.msra.mxu2 %v50_v34  ;;  %170 = vmatpush.msra.mxu3 %v51_v35  ;;  %v52_v53 = vld [vmem:[#allocation2 + $0x70] sm:$0xff]  ;;  %v47_v54 = vld [vmem:[#allocation2 + $0x48] sm:$0xff]  ;;  %v42_v55 = vld [vmem:[#allocation2 + $0x20] sm:$0xff] }
  0x1a   :  { %111 = vmatpush.msra.mxu0 %v43_v36  ;;  %131 = vmatpush.msra.mxu1 %v44_v37 }
  0x1b   :  { %151 = vmatpush.msra.mxu2 %v45_v38  ;;  %171 = vmatpush.msra.mxu3 %v46_v39 }
  0x1c   :  { %112 = vmatpush.msra.mxu0 %v38_v40  ;;  %132 = vmatpush.msra.mxu1 %v39_v41 }
  0x1d   :  { %152 = vmatpush.msra.mxu2 %v40_v42  ;;  %172 = vmatpush.msra.mxu3 %v41_v43  ;;  %v275_v42 = vld [vmem:[%s516_s2] sm:$0xff]  ;;  %s434_s2 = smov [#allocation5]  }
  0x1e   :  { %318 = vmatmul.msk.f32.vlgmr.msra.gmra.mxu0 %vm93_vm0, %v37_v44  ;;  %319 = vmatmul.msk.f32.vlgmr.msra.gmra.mxu1 %vm93_vm0, %v37_v44 }
  0x1f   :  { %320 = vmatmul.msk.f32.vlgmr.msra.gmra.mxu2 %vm93_vm0, %v37_v44  ;;  %321 = vmatmul.msk.f32.vlgmr.msra.gmra.mxu3 %vm93_vm0, %v37_v44 }
  0x20   :  { %182 = vmatpush.msrb.mxu0 %v92_v45 }
  0x22   :  { %183 = vmatpush.msrb.mxu0 %v87_v46  ;;  %v278_v46 = vld [vmem:[%s517_s3] sm:$0xff]  ;;  %s290_s3 = sshll.u32 %s434_s2, 4  ;;  %s291_s3 = int_to_ptr.vmem [resolvable:$true] %s290_s3 }
  0x24   :  { %184 = vmatpush.msrb.mxu0 %v82_v47 }
  0x26   :  { %185 = vmatpush.msrb.mxu0 %v77_v48 }
  0x28   :  { %186 = vmatpush.msrb.mxu0 %v72_v49 }
  0x2a   :  { %187 = vmatpush.msrb.mxu0 %v67_v50 }
  0x2c   :  { %188 = vmatpush.msrb.mxu0 %v62_v51 }
  0x2e   :  { %189 = vmatpush.msrb.mxu0 %v57_v52 }
  0x30   :  { %190 = vmatpush.msrb.mxu0 %v52_v53 }
  0x32   :  { %191 = vmatpush.msrb.mxu0 %v47_v54 }
  0x34   :  { %192 = vmatpush.msrb.mxu0 %v42_v55 }
  0x35   :  { %322 = vmatmul.msk.f32.vlgmr.msrb.gmra.mxu0 %vm93_vm0, %v37_v44 }
  0x9b   :  { %v114_v56 = vpop.f32.mrf.mxu0  ;;  %v134_v57 = vpop.f32.mrf.mxu1 }
  0x9c   :  { %v323_v58 = vmul.f32 -1.442695, %v114_v56  ;;  %v324_v59 = vmul.f32 -1.442695, %v134_v57 }
  0x9e   :  { %332 = vpow2.f32 %v323_v58 }
  0x9f   :  { %334 = vpow2.f32 %v324_v59 }
  0xa2   :  { %v154_v60 = vpop.f32.mrf.mxu2  ;;  %v174_v61 = vpop.f32.mrf.mxu3 }
  0xa3   :  { %v325_v62 = vmul.f32 -1.442695, %v154_v60  ;;  %v326_v63 = vmul.f32 -1.442695, %v174_v61 }
  0xa4   :  { %v333_v0 = vpop.eup %332 }
  0xa5   :  { %v335_v1 = vpop.eup %334  ;;  %v209_v2 = vadd.f32 1.0, %v333_v0  ;;  %336 = vpow2.f32 %v325_v62 }
  0xa6   :  { %v210_v3 = vadd.f32 1.0, %v335_v1  ;;  %338 = vpow2.f32 %v326_v63 }
  0xa7   :  { %340 = vrcp.f32 %v209_v2  ;;  %vm218_vm1 = vweird.f32 %v209_v2  ;;  %v222_v21 = vand.u32 2147483647, %v209_v2  ;;  %v224_v22 = vand.u32 2147483648, %v209_v2 }
  0xa8   :  { %342 = vrcp.f32 %v210_v3  ;;  %vm233_vm3 = vweird.f32 %v210_v3  ;;  %v237_v25 = vand.u32 2147483647, %v210_v3  ;;  %v239_v26 = vand.u32 2147483648, %v210_v3 }
  0xa9   :  { %v225_v34 = vor.u32 1.1754944e-38, %v224_v22  ;;  %vm223_vm9 = vcmp.eq.f32.partialorder %v222_v21, 8.507059e+37 }
  0xaa   :  { %v240_v38 = vor.u32 1.1754944e-38, %v239_v26  ;;  %vm238_vm11 = vcmp.eq.f32.partialorder %v237_v25, 8.507059e+37 }
  0xab   :  { %v337_v4 = vpop.eup %336 }
  0xac   :  { %v339_v5 = vpop.eup %338  ;;  %v211_v6 = vadd.f32 1.0, %v337_v4 }
  0xad   :  { %v341_v7 = vpop.eup %340  ;;  %v476_v8 = vadd.f32 1.0, %v339_v5 }
  0xae   :  { %v343_v9 = vpop.eup %342  ;;  %v214_v10 = vmul.f32 %v341_v7, %v209_v2  ;;  %344 = vrcp.f32 %v211_v6  ;;  %vm219_vm2 = vweird.f32 %v341_v7  ;;  %v254_v27 = vand.u32 2147483648, %v211_v6 }
  0xaf   :  { %v229_v11 = vmul.f32 %v343_v9, %v210_v3  ;;  %346 = vrcp.f32 %v476_v8  ;;  %vm234_vm4 = vweird.f32 %v343_v9  ;;  %vm483_vm5 = vmor %vm218_vm1, %vm219_vm2  ;;  %v252_v32 = vand.u32 2147483647, %v211_v6 }
  0xb0   :  { %v215_v12 = vsub.f32 1.0, %v214_v10  ;;  %vm489_vm7 = vmor %vm233_vm3, %vm234_vm4  ;;  %vm248_vm8 = vweird.f32 %v211_v6  ;;  %v255_v39 = vor.u32 1.1754944e-38, %v254_v27  ;;  %vm263_vm13 = vweird.f32 %v476_v8 }
  0xb1   :  { %v230_v13 = vsub.f32 1.0, %v229_v11  ;;  %vm253_vm12 = vcmp.eq.f32.partialorder %v252_v32, 8.507059e+37  ;;  %v269_v53 = vand.u32 2147483648, %v476_v8  ;;  %v267_v55 = vand.u32 2147483647, %v476_v8 }
  0xb2   :  { %v216_v14 = vmul.f32 %v341_v7, %v215_v12  ;;  %v194_v16 = vpop.f32.mrf.mxu0 }
  0xb3   :  { %v231_v15 = vmul.f32 %v343_v9, %v230_v13  ;;  %348 = vtanh.f32 %v194_v16  ;;  %v270_v56 = vor.u32 1.1754944e-38, %v269_v53  ;;  %vm268_vm0 = vcmp.eq.f32.partialorder %v267_v55, 8.507059e+37 }
  0xb4   :  { %v345_v17 = vpop.eup %344  ;;  %v217_v20 = vadd.f32 %v341_v7, %v216_v14 }
  0xb5   :  { %v479_v18 = vpop.eup %346  ;;  %v244_v19 = vmul.f32 %v345_v17, %v211_v6  ;;  %v232_v23 = vadd.f32 %v343_v9, %v231_v15  ;;  %vm249_vm6 = vweird.f32 %v345_v17 }
  0xb6   :  { %v259_v28 = vmul.f32 %v479_v18, %v476_v8  ;;  %v221_v31 = vsel %vm483_vm5, %v341_v7, %v217_v20  ;;  %vm250_vm10 = vmor %vm248_vm8, %vm249_vm6  ;;  %vm264_vm14 = vweird.f32 %v479_v18 }
  0xb7   :  { %v245_v24 = vsub.f32 1.0, %v244_v19  ;;  %v236_v35 = vsel %vm489_vm7, %v343_v9, %v232_v23  ;;  %v226_v41 = vsel %vm223_vm9, %v225_v34, %v221_v31  ;;  %vm265_vm15 = vmor %vm263_vm13, %vm264_vm14 }
  0xb8   :  { %v260_v40 = vsub.f32 1.0, %v259_v28  ;;  %v241_v44 = vsel %vm238_vm11, %v240_v38, %v236_v35 }
  0xb9   :  { %v246_v30 = vmul.f32 %v345_v17, %v245_v24  ;;  %v349_v37 = vpop.eup %348  ;;  %v279_v51 = vmul.f32 %v278_v46, %v241_v44 }
  0xba   :  { %v274_v47 = vmul.f32 %v349_v37, %v226_v41  ;;  %v261_v49 = vmul.f32 %v479_v18, %v260_v40 }
  0xbb   :  { %v247_v36 = vadd.f32 %v345_v17, %v246_v30 }
  0xbc   :  { %v262_v54 = vadd.f32 %v479_v18, %v261_v49 }
  0xbd   :  { %v251_v43 = vsel %vm250_vm10, %v345_v17, %v247_v36 }
  0xbe   :  { %v256_v45 = vsel %vm253_vm12, %v255_v39, %v251_v43  ;;  %v266_v57 = vsel %vm265_vm15, %v479_v18, %v262_v54 }
  0xbf   :  { %v276_v48 = vmul.f32 %v275_v42, %v256_v45  ;;  %v271_v59 = vsel %vm268_vm0, %v270_v56, %v266_v57 }
  0xc1   :  { %v277_v50 = vadd.f32 %v276_v48, %v274_v47 }
  0xc3   :  { %v280_v52 = vadd.f32 %v279_v51, %v277_v50 }
  0xc5   :  { %284 = vst [vmem:[#allocation6] sm:$0xff] %v280_v52  ;;  %350 = vtanh.f32 %v280_v52 }
  0xc6   :  { %306 = dma.vmem_to_hbm [thread:$0]  %s302_s30, 128, %s304_s8, [#allocation7]  }
  0xcb   :  { %v351_v58 = vpop.eup %350 }
  0xcc   :  { %v282_v60 = vmul.f32 %v351_v58, %v271_v59 }
  0xce   :  { %283 = vst [vmem:[#allocation5] sm:$0xff] %v282_v60 }
  0xcf   :  { %295 = dma.vmem_to_hbm [thread:$0]  %s291_s3, 128, %s293_s10, [#allocation4]  }
  0xd0   :  { %426 = dma.done.wait [#allocation4], 128  }
  0xd1   :  { %427 = vsyncadd [#allocation4], 4294967168 }
  0xd2   :  { %428 = dma.done.wait [#allocation7], 128  }
  0xd3   :  { %429 = vsyncadd [#allocation7], 4294967168 }
  0xd4   :  { %315 = vsyncpa [#allocation3], 1 }
  0xd5   :  { %316 = vsyncpa [#allocation4], 1 }
  0xd6   :  { %317 = vsyncpa [#allocation7], 1 }

</bundles_post_ra>
